<compile_context>
chip_gen: v5e
topology: v5e:2x2
jax: 0.10.0
libtpu: 0.0.40
codegen_flags: <defaults>
</compile_context>

<pallas_src>
import jax
import jax.numpy as jnp
from jax.experimental import pallas as pl
from jax.experimental.pallas import tpu as pltpu  # noqa: F401  (TPU backend)

OBS_HIDDEN = 128
AUX_HIDDEN = 16


# ---------------------------------------------------------------------------
# Fused Pallas kernel: aux GRU cell + obs GRU cell + affine head
# ---------------------------------------------------------------------------
def _policy_kernel(
    x_ref,          # (1, D_obs)      observation
    r_ref,          # (1, 1)          prev_reward
    h_obs_ref,      # (1, 128)        obs GRU hidden state
    h_aux_ref,      # (1, 16)         aux GRU hidden state
    wi_aux_ref,     # (3, 16)         aux W_ih per gate (input dim is 1)
    wh_aux_ref,     # (3, 16, 16)     aux W_hh^T per gate  (in, out)
    bi_aux_ref,     # (3, 16)         aux b_ih per gate
    bh_aux_ref,     # (3, 16)         aux b_hh per gate
    wi_obs_x_ref,   # (D_obs, 384)    obs part of W_ih^T
    wi_obs_a_ref,   # (16, 384)       aux part of W_ih^T  (folds the concat)
    wh_obs_ref,     # (128, 384)      W_hh^T
    bi_obs_ref,     # (1, 384)
    bh_obs_ref,     # (1, 384)
    w_aff_ref,      # (128, A)        affine weight^T
    b_aff_ref,      # (1, A)
    logits_ref,     # (1, A)          out
    new_h_obs_ref,  # (1, 128)        out
    new_h_aux_ref,  # (1, 16)         out
):
    f32 = jnp.float32
    H = OBS_HIDDEN

    # ---------------- aux GRU cell (input = scalar prev_reward) -------------
    r_in = r_ref[...]                                   # (1, 1)
    h_aux = h_aux_ref[...]                              # (1, 16)

    def aux_gate(g):
        # gate pre-activations for gate g in {0:r, 1:z, 2:n}
        gi = r_in * wi_aux_ref[pl.ds(g, 1), :] + bi_aux_ref[pl.ds(g, 1), :]
        gh = (jnp.dot(h_aux, wh_aux_ref[g], preferred_element_type=f32)
              + bh_aux_ref[pl.ds(g, 1), :])
        return gi, gh

    gi_r, gh_r = aux_gate(0)
    gi_z, gh_z = aux_gate(1)
    gi_n, gh_n = aux_gate(2)
    r_a = jax.nn.sigmoid(gi_r + gh_r)
    z_a = jax.nn.sigmoid(gi_z + gh_z)
    n_a = jnp.tanh(gi_n + r_a * gh_n)
    aux_new = (1.0 - z_a) * n_a + z_a * h_aux           # (1, 16)
    new_h_aux_ref[...] = aux_new

    # -------- obs GRU cell (torch.cat folded into a split W_ih matmul) ------
    h_obs = h_obs_ref[...]                              # (1, 128)
    gi = (jnp.dot(x_ref[...], wi_obs_x_ref[...], preferred_element_type=f32)
          + jnp.dot(aux_new, wi_obs_a_ref[...], preferred_element_type=f32)
          + bi_obs_ref[...])                            # (1, 384), lane-dense
    gh = (jnp.dot(h_obs, wh_obs_ref[...], preferred_element_type=f32)
          + bh_obs_ref[...])                            # (1, 384)

    # gate slices land exactly on 128-lane vreg boundaries (r | z | n)
    r_o = jax.nn.sigmoid(gi[:, 0:H] + gh[:, 0:H])
    z_o = jax.nn.sigmoid(gi[:, H:2 * H] + gh[:, H:2 * H])
    n_o = jnp.tanh(gi[:, 2 * H:3 * H] + r_o * gh[:, 2 * H:3 * H])
    h_new = (1.0 - z_o) * n_o + z_o * h_obs             # (1, 128)
    new_h_obs_ref[...] = h_new

    # ------------------------------ affine head -----------------------------
    logits_ref[...] = (jnp.dot(h_new, w_aff_ref[...], preferred_element_type=f32)
                       + b_aff_ref[...])


def _full_spec(shape):
    # whole-array block (grid-less call; everything is tiny and VMEM-resident)
    return pl.BlockSpec(shape, lambda: tuple(0 for _ in shape))


# ---------------------------------------------------------------------------
# Parameters: torch-native init + one-time transform to kernel layout
# ---------------------------------------------------------------------------
def init_torch_params(key, observation_space, action_space):
    """Same shapes / init as the PyTorch module (uniform(-0.1, 0.1))."""
    d = 0.1
    d_in_obs = observation_space + AUX_HIDDEN
    keys = jax.random.split(key, 10)
    u = lambda k, s: jax.random.uniform(k, s, jnp.float32, -d, d)
    return {
        "w_ih_aux": u(keys[0], (3 * AUX_HIDDEN, 1)),
        "w_hh_aux": u(keys[1], (3 * AUX_HIDDEN, AUX_HIDDEN)),
        "b_ih_aux": u(keys[2], (3 * AUX_HIDDEN,)),
        "b_hh_aux": u(keys[3], (3 * AUX_HIDDEN,)),
        "w_ih_obs": u(keys[4], (3 * OBS_HIDDEN, d_in_obs)),
        "w_hh_obs": u(keys[5], (3 * OBS_HIDDEN, OBS_HIDDEN)),
        "b_ih_obs": u(keys[6], (3 * OBS_HIDDEN,)),
        "b_hh_obs": u(keys[7], (3 * OBS_HIDDEN,)),
        "w_aff":    u(keys[8], (action_space, OBS_HIDDEN)),
        "b_aff":    u(keys[9], (action_space,)),
    }


def to_kernel_params(tp, observation_space):
    """One-time layout transform so the per-step path is a single pallas_call."""
    H, HA = OBS_HIDDEN, AUX_HIDDEN
    return {
        # aux GRU, packed per gate (r, z, n)
        "wi_aux": tp["w_ih_aux"].reshape(3, HA),
        "wh_aux": tp["w_hh_aux"].reshape(3, HA, HA).transpose(0, 2, 1),  # (g, in, out)
        "bi_aux": tp["b_ih_aux"].reshape(3, HA),
        "bh_aux": tp["b_hh_aux"].reshape(3, HA),
        # obs GRU, transposed + split into (obs | aux) column blocks of the concat
        "wi_obs_x": jnp.transpose(tp["w_ih_obs"][:, :observation_space]),  # (D_obs, 384)
        "wi_obs_a": jnp.transpose(tp["w_ih_obs"][:, observation_space:]),  # (16, 384)
        "wh_obs":   jnp.transpose(tp["w_hh_obs"]),                         # (128, 384)
        "bi_obs":   tp["b_ih_obs"].reshape(1, 3 * H),
        "bh_obs":   tp["b_hh_obs"].reshape(1, 3 * H),
        # affine head
        "w_aff": jnp.transpose(tp["w_aff"]),                               # (128, A)
        "b_aff": tp["b_aff"].reshape(1, -1),
    }


def init_state():
    # Mirrors init_state(): (num_layers, batch=1, hidden)
    return (jnp.zeros((1, 1, OBS_HIDDEN), jnp.float32),
            jnp.zeros((1, 1, AUX_HIDDEN), jnp.float32))


# ---------------------------------------------------------------------------
# Forward wrapper (mirrors RecurrentPolicyDiscrete.forward)
# ---------------------------------------------------------------------------
def recurrent_policy_forward(obs, prev_reward, state, params):
    h_obs_state, h_aux_state = state
    d_obs = obs.shape[-1]
    act = params["b_aff"].shape[-1]

    x = obs.reshape(1, d_obs).astype(jnp.float32)
    r = prev_reward.reshape(1, 1).astype(jnp.float32)
    h_obs = h_obs_state.reshape(1, OBS_HIDDEN).astype(jnp.float32)
    h_aux = h_aux_state.reshape(1, AUX_HIDDEN).astype(jnp.float32)

    args = (x, r, h_obs, h_aux,
            params["wi_aux"], params["wh_aux"], params["bi_aux"], params["bh_aux"],
            params["wi_obs_x"], params["wi_obs_a"], params["wh_obs"],
            params["bi_obs"], params["bh_obs"],
            params["w_aff"], params["b_aff"])

    logits, new_h_obs, new_h_aux = pl.pallas_call(
        _policy_kernel,
        out_shape=(
            jax.ShapeDtypeStruct((1, act), jnp.float32),
            jax.ShapeDtypeStruct((1, OBS_HIDDEN), jnp.float32),
            jax.ShapeDtypeStruct((1, AUX_HIDDEN), jnp.float32),
        ),
        in_specs=[_full_spec(a.shape) for a in args],
        out_specs=(
            _full_spec((1, act)),
            _full_spec((1, OBS_HIDDEN)),
            _full_spec((1, AUX_HIDDEN)),
        ),
    )(*args)

    new_state = (new_h_obs.reshape(1, 1, OBS_HIDDEN),
                 new_h_aux.reshape(1, 1, AUX_HIDDEN))
    # TODO(synk): torch State namedtuple / Variable.detach autograd bookkeeping
    # has no JAX equivalent; state is returned as a plain (obs, aux) tuple.
    return logits, new_state


# ---------------------------------------------------------------------------
# Pure-JAX reference (torch GRU equations, torch-native weight layout)
# ---------------------------------------------------------------------------
def reference_forward(obs, prev_reward, state, tp):
    hi = jax.lax.Precision.HIGHEST

    def gru_cell(x, h, w_ih, w_hh, b_ih, b_hh, hid):
        gi = jnp.dot(x, w_ih.T, precision=hi) + b_ih
        gh = jnp.dot(h, w_hh.T, precision=hi) + b_hh
        i_r, i_z, i_n = gi[:, :hid], gi[:, hid:2 * hid], gi[:, 2 * hid:]
        h_r, h_z, h_n = gh[:, :hid], gh[:, hid:2 * hid], gh[:, 2 * hid:]
        r = jax.nn.sigmoid(i_r + h_r)
        z = jax.nn.sigmoid(i_z + h_z)
        n = jnp.tanh(i_n + r * h_n)
        return (1.0 - z) * n + z * h

    h_obs = state[0][0]
    h_aux = state[1][0]
    r_in = prev_reward.reshape(1, 1)
    aux_new = gru_cell(r_in, h_aux, tp["w_ih_aux"], tp["w_hh_aux"],
                       tp["b_ih_aux"], tp["b_hh_aux"], AUX_HIDDEN)
    x_cat = jnp.concatenate([obs.reshape(1, -1), aux_new], axis=1)
    h_new = gru_cell(x_cat, h_obs, tp["w_ih_obs"], tp["w_hh_obs"],
                     tp["b_ih_obs"], tp["b_hh_obs"], OBS_HIDDEN)
    logits = jnp.dot(h_new, tp["w_aff"].T, precision=hi) + tp["b_aff"]
    return logits, (h_new.reshape(1, 1, OBS_HIDDEN), aux_new.reshape(1, 1, AUX_HIDDEN))


# ---------------------------------------------------------------------------
if __name__ == "__main__":
    key = jax.random.PRNGKey(0)
    k_obs, k_r, k_ho, k_ha, k_p = jax.random.split(key, 5)

    observation_space = 32
    action_space = 6

    torch_params = init_torch_params(k_p, observation_space, action_space)
    params = to_kernel_params(torch_params, observation_space)

    obs = jax.random.normal(k_obs, (1, observation_space), jnp.float32)
    prev_reward = jax.random.normal(k_r, (1,), jnp.float32)
    state = (0.1 * jax.random.normal(k_ho, (1, 1, OBS_HIDDEN), jnp.float32),
             0.1 * jax.random.normal(k_ha, (1, 1, AUX_HIDDEN), jnp.float32))

    fwd = jax.jit(recurrent_policy_forward)
    logits, (new_obs_state, new_aux_state) = fwd(obs, prev_reward, state, params)
    logits = jax.block_until_ready(logits)
    new_obs_state = jax.block_until_ready(new_obs_state)
    new_aux_state = jax.block_until_ready(new_aux_state)

    assert logits.shape == (1, action_space)
    assert new_obs_state.shape == (1, 1, OBS_HIDDEN)
    assert new_aux_state.shape == (1, 1, AUX_HIDDEN)
    assert bool(jnp.all(jnp.isfinite(logits)))
    assert bool(jnp.all(jnp.isfinite(new_obs_state)))
    assert bool(jnp.all(jnp.isfinite(new_aux_state)))

    # Correctness vs. a pure-JAX reference of the torch GRU/Linear math.
    ref_logits, (ref_obs_state, ref_aux_state) = reference_forward(
        obs, prev_reward, state, torch_params)
    assert bool(jnp.allclose(logits, ref_logits, atol=1e-3, rtol=1e-3))
    assert bool(jnp.allclose(new_obs_state, ref_obs_state, atol=1e-3, rtol=1e-3))
    assert bool(jnp.allclose(new_aux_state, ref_aux_state, atol=1e-3, rtol=1e-3))

    print("KERNEL_OK")
</pallas_src>

<mosaic_0001>
module attributes {stable_mosaic.version = 11 : i64} {
  func.func @_policy_kernel(%arg0: memref<1x32xf32, #tpu.memory_space<vmem>>, %arg1: memref<1x1xf32, #tpu.memory_space<vmem>>, %arg2: memref<1x128xf32, #tpu.memory_space<vmem>>, %arg3: memref<1x16xf32, #tpu.memory_space<vmem>>, %arg4: memref<3x16xf32, #tpu.memory_space<vmem>>, %arg5: memref<3x16x16xf32, #tpu.memory_space<vmem>>, %arg6: memref<3x16xf32, #tpu.memory_space<vmem>>, %arg7: memref<3x16xf32, #tpu.memory_space<vmem>>, %arg8: memref<32x384xf32, #tpu.memory_space<vmem>>, %arg9: memref<16x384xf32, #tpu.memory_space<vmem>>, %arg10: memref<128x384xf32, #tpu.memory_space<vmem>>, %arg11: memref<1x384xf32, #tpu.memory_space<vmem>>, %arg12: memref<1x384xf32, #tpu.memory_space<vmem>>, %arg13: memref<128x6xf32, #tpu.memory_space<vmem>>, %arg14: memref<1x6xf32, #tpu.memory_space<vmem>>, %arg15: memref<1x6xf32, #tpu.memory_space<vmem>>, %arg16: memref<1x128xf32, #tpu.memory_space<vmem>>, %arg17: memref<1x16xf32, #tpu.memory_space<vmem>>) attributes {dimension_semantics = [], scalar_prefetch = 0 : i64, scratch_operands = 0 : i64, tpu.core_type = #tpu.core_type<tc>} {
    %c0 = arith.constant 0 : index
    %c0_0 = arith.constant 0 : index
    %0 = vector.load %arg1[%c0, %c0_0] : memref<1x1xf32, #tpu.memory_space<vmem>>, vector<1x1xf32>
    %c0_1 = arith.constant 0 : index
    %c0_2 = arith.constant 0 : index
    %1 = vector.load %arg3[%c0_1, %c0_2] : memref<1x16xf32, #tpu.memory_space<vmem>>, vector<1x16xf32>
    %c0_3 = arith.constant 0 : index
    %c0_4 = arith.constant 0 : index
    %2 = vector.load %arg4[%c0_3, %c0_4] : memref<3x16xf32, #tpu.memory_space<vmem>>, vector<1x16xf32>
    %3 = vector.broadcast %0 : vector<1x1xf32> to vector<1x16xf32>
    %4 = arith.mulf %3, %2 : vector<1x16xf32>
    %c0_5 = arith.constant 0 : index
    %c0_6 = arith.constant 0 : index
    %5 = vector.load %arg6[%c0_5, %c0_6] : memref<3x16xf32, #tpu.memory_space<vmem>>, vector<1x16xf32>
    %6 = arith.addf %4, %5 : vector<1x16xf32>
    %c0_7 = arith.constant 0 : index
    %c0_8 = arith.constant 0 : index
    %c0_9 = arith.constant 0 : index
    %7 = vector.load %arg5[%c0_7, %c0_8, %c0_9] : memref<3x16x16xf32, #tpu.memory_space<vmem>>, vector<1x16x16xf32>
    %8 = vector.shape_cast %7 : vector<1x16x16xf32> to vector<16x16xf32>
    %cst = arith.constant dense<0.000000e+00> : vector<1x16xf32>
    %9 = tpu.matmul %1, %8, %cst {dimension_numbers = #tpu.dot_dimension_numbers<[1], [0], [0], [1], [0, 0, 1, 1], [], []>} : vector<1x16xf32>, vector<16x16xf32>, vector<1x16xf32> -> vector<1x16xf32>
    %c0_10 = arith.constant 0 : index
    %c0_11 = arith.constant 0 : index
    %10 = vector.load %arg7[%c0_10, %c0_11] : memref<3x16xf32, #tpu.memory_space<vmem>>, vector<1x16xf32>
    %11 = arith.addf %9, %10 : vector<1x16xf32>
    %c1 = arith.constant 1 : index
    %c0_12 = arith.constant 0 : index
    %12 = vector.load %arg4[%c1, %c0_12] : memref<3x16xf32, #tpu.memory_space<vmem>>, vector<1x16xf32>
    %13 = vector.broadcast %0 : vector<1x1xf32> to vector<1x16xf32>
    %14 = arith.mulf %13, %12 : vector<1x16xf32>
    %c1_13 = arith.constant 1 : index
    %c0_14 = arith.constant 0 : index
    %15 = vector.load %arg6[%c1_13, %c0_14] : memref<3x16xf32, #tpu.memory_space<vmem>>, vector<1x16xf32>
    %16 = arith.addf %14, %15 : vector<1x16xf32>
    %c1_15 = arith.constant 1 : index
    %c0_16 = arith.constant 0 : index
    %c0_17 = arith.constant 0 : index
    %17 = vector.load %arg5[%c1_15, %c0_16, %c0_17] : memref<3x16x16xf32, #tpu.memory_space<vmem>>, vector<1x16x16xf32>
    %18 = vector.shape_cast %17 : vector<1x16x16xf32> to vector<16x16xf32>
    %cst_18 = arith.constant dense<0.000000e+00> : vector<1x16xf32>
    %19 = tpu.matmul %1, %18, %cst_18 {dimension_numbers = #tpu.dot_dimension_numbers<[1], [0], [0], [1], [0, 0, 1, 1], [], []>} : vector<1x16xf32>, vector<16x16xf32>, vector<1x16xf32> -> vector<1x16xf32>
    %c1_19 = arith.constant 1 : index
    %c0_20 = arith.constant 0 : index
    %20 = vector.load %arg7[%c1_19, %c0_20] : memref<3x16xf32, #tpu.memory_space<vmem>>, vector<1x16xf32>
    %21 = arith.addf %19, %20 : vector<1x16xf32>
    %c2 = arith.constant 2 : index
    %c0_21 = arith.constant 0 : index
    %22 = vector.load %arg4[%c2, %c0_21] : memref<3x16xf32, #tpu.memory_space<vmem>>, vector<1x16xf32>
    %23 = vector.broadcast %0 : vector<1x1xf32> to vector<1x16xf32>
    %24 = arith.mulf %23, %22 : vector<1x16xf32>
    %c2_22 = arith.constant 2 : index
    %c0_23 = arith.constant 0 : index
    %25 = vector.load %arg6[%c2_22, %c0_23] : memref<3x16xf32, #tpu.memory_space<vmem>>, vector<1x16xf32>
    %26 = arith.addf %24, %25 : vector<1x16xf32>
    %c2_24 = arith.constant 2 : index
    %c0_25 = arith.constant 0 : index
    %c0_26 = arith.constant 0 : index
    %27 = vector.load %arg5[%c2_24, %c0_25, %c0_26] : memref<3x16x16xf32, #tpu.memory_space<vmem>>, vector<1x16x16xf32>
    %28 = vector.shape_cast %27 : vector<1x16x16xf32> to vector<16x16xf32>
    %cst_27 = arith.constant dense<0.000000e+00> : vector<1x16xf32>
    %29 = tpu.matmul %1, %28, %cst_27 {dimension_numbers = #tpu.dot_dimension_numbers<[1], [0], [0], [1], [0, 0, 1, 1], [], []>} : vector<1x16xf32>, vector<16x16xf32>, vector<1x16xf32> -> vector<1x16xf32>
    %c2_28 = arith.constant 2 : index
    %c0_29 = arith.constant 0 : index
    %30 = vector.load %arg7[%c2_28, %c0_29] : memref<3x16xf32, #tpu.memory_space<vmem>>, vector<1x16xf32>
    %31 = arith.addf %29, %30 : vector<1x16xf32>
    %32 = arith.addf %6, %11 : vector<1x16xf32>
    %33 = arith.negf %32 : vector<1x16xf32>
    %34 = math.exp %33 : vector<1x16xf32>
    %cst_30 = arith.constant 1.000000e+00 : f32
    %35 = vector.broadcast %cst_30 : f32 to vector<1x16xf32>
    %36 = arith.addf %35, %34 : vector<1x16xf32>
    %37 = arith.divf %35, %36 : vector<1x16xf32>
    %38 = arith.addf %16, %21 : vector<1x16xf32>
    %39 = arith.negf %38 : vector<1x16xf32>
    %40 = math.exp %39 : vector<1x16xf32>
    %cst_31 = arith.constant 1.000000e+00 : f32
    %41 = vector.broadcast %cst_31 : f32 to vector<1x16xf32>
    %42 = arith.addf %41, %40 : vector<1x16xf32>
    %43 = arith.divf %41, %42 : vector<1x16xf32>
    %44 = arith.mulf %37, %31 : vector<1x16xf32>
    %45 = arith.addf %26, %44 : vector<1x16xf32>
    %46 = math.tanh %45 : vector<1x16xf32>
    %cst_32 = arith.constant 1.000000e+00 : f32
    %47 = vector.broadcast %cst_32 : f32 to vector<1x16xf32>
    %48 = arith.subf %47, %43 : vector<1x16xf32>
    %49 = arith.mulf %48, %46 : vector<1x16xf32>
    %50 = arith.mulf %43, %1 : vector<1x16xf32>
    %51 = arith.addf %49, %50 : vector<1x16xf32>
    %c0_33 = arith.constant 0 : index
    %c0_34 = arith.constant 0 : index
    %52 = vector.load %arg17[%c0_33, %c0_34] : memref<1x16xf32, #tpu.memory_space<vmem>>, vector<1x16xf32>
    tpu.vector_store %arg17[%c0_33, %c0_34], %51 {strides = array<i32>} : memref<1x16xf32, #tpu.memory_space<vmem>>, vector<1x16xf32>,
    %c0_35 = arith.constant 0 : index
    %c0_36 = arith.constant 0 : index
    %53 = vector.load %arg2[%c0_35, %c0_36] : memref<1x128xf32, #tpu.memory_space<vmem>>, vector<1x128xf32>
    %c0_37 = arith.constant 0 : index
    %c0_38 = arith.constant 0 : index
    %54 = vector.load %arg0[%c0_37, %c0_38] : memref<1x32xf32, #tpu.memory_space<vmem>>, vector<1x32xf32>
    %c0_39 = arith.constant 0 : index
    %c0_40 = arith.constant 0 : index
    %55 = vector.load %arg8[%c0_39, %c0_40] : memref<32x384xf32, #tpu.memory_space<vmem>>, vector<32x384xf32>
    %cst_41 = arith.constant dense<0.000000e+00> : vector<1x384xf32>
    %56 = tpu.matmul %54, %55, %cst_41 {dimension_numbers = #tpu.dot_dimension_numbers<[1], [0], [0], [1], [0, 0, 1, 1], [], []>} : vector<1x32xf32>, vector<32x384xf32>, vector<1x384xf32> -> vector<1x384xf32>
    %c0_42 = arith.constant 0 : index
    %c0_43 = arith.constant 0 : index
    %57 = vector.load %arg9[%c0_42, %c0_43] : memref<16x384xf32, #tpu.memory_space<vmem>>, vector<16x384xf32>
    %cst_44 = arith.constant dense<0.000000e+00> : vector<1x384xf32>
    %58 = tpu.matmul %51, %57, %cst_44 {dimension_numbers = #tpu.dot_dimension_numbers<[1], [0], [0], [1], [0, 0, 1, 1], [], []>} : vector<1x16xf32>, vector<16x384xf32>, vector<1x384xf32> -> vector<1x384xf32>
    %59 = arith.addf %56, %58 : vector<1x384xf32>
    %c0_45 = arith.constant 0 : index
    %c0_46 = arith.constant 0 : index
    %60 = vector.load %arg11[%c0_45, %c0_46] : memref<1x384xf32, #tpu.memory_space<vmem>>, vector<1x384xf32>
    %61 = arith.addf %59, %60 : vector<1x384xf32>
    %c0_47 = arith.constant 0 : index
    %c0_48 = arith.constant 0 : index
    %62 = vector.load %arg10[%c0_47, %c0_48] : memref<128x384xf32, #tpu.memory_space<vmem>>, vector<128x384xf32>
    %cst_49 = arith.constant dense<0.000000e+00> : vector<1x384xf32>
    %63 = tpu.matmul %53, %62, %cst_49 {dimension_numbers = #tpu.dot_dimension_numbers<[1], [0], [0], [1], [0, 0, 1, 1], [], []>} : vector<1x128xf32>, vector<128x384xf32>, vector<1x384xf32> -> vector<1x384xf32>
    %c0_50 = arith.constant 0 : index
    %c0_51 = arith.constant 0 : index
    %64 = vector.load %arg12[%c0_50, %c0_51] : memref<1x384xf32, #tpu.memory_space<vmem>>, vector<1x384xf32>
    %65 = arith.addf %63, %64 : vector<1x384xf32>
    %66 = vector.extract_strided_slice %61 {offsets = [0, 0], sizes = [1, 128], strides = [1, 1]} : vector<1x384xf32> to vector<1x128xf32>
    %67 = vector.extract_strided_slice %65 {offsets = [0, 0], sizes = [1, 128], strides = [1, 1]} : vector<1x384xf32> to vector<1x128xf32>
    %68 = arith.addf %66, %67 : vector<1x128xf32>
    %69 = arith.negf %68 : vector<1x128xf32>
    %70 = math.exp %69 : vector<1x128xf32>
    %cst_52 = arith.constant 1.000000e+00 : f32
    %71 = vector.broadcast %cst_52 : f32 to vector<1x128xf32>
    %72 = arith.addf %71, %70 : vector<1x128xf32>
    %73 = arith.divf %71, %72 : vector<1x128xf32>
    %74 = vector.extract_strided_slice %61 {offsets = [0, 128], sizes = [1, 128], strides = [1, 1]} : vector<1x384xf32> to vector<1x128xf32>
    %75 = vector.extract_strided_slice %65 {offsets = [0, 128], sizes = [1, 128], strides = [1, 1]} : vector<1x384xf32> to vector<1x128xf32>
    %76 = arith.addf %74, %75 : vector<1x128xf32>
    %77 = arith.negf %76 : vector<1x128xf32>
    %78 = math.exp %77 : vector<1x128xf32>
    %cst_53 = arith.constant 1.000000e+00 : f32
    %79 = vector.broadcast %cst_53 : f32 to vector<1x128xf32>
    %80 = arith.addf %79, %78 : vector<1x128xf32>
    %81 = arith.divf %79, %80 : vector<1x128xf32>
    %82 = vector.extract_strided_slice %61 {offsets = [0, 256], sizes = [1, 128], strides = [1, 1]} : vector<1x384xf32> to vector<1x128xf32>
    %83 = vector.extract_strided_slice %65 {offsets = [0, 256], sizes = [1, 128], strides = [1, 1]} : vector<1x384xf32> to vector<1x128xf32>
    %84 = arith.mulf %73, %83 : vector<1x128xf32>
    %85 = arith.addf %82, %84 : vector<1x128xf32>
    %86 = math.tanh %85 : vector<1x128xf32>
    %cst_54 = arith.constant 1.000000e+00 : f32
    %87 = vector.broadcast %cst_54 : f32 to vector<1x128xf32>
    %88 = arith.subf %87, %81 : vector<1x128xf32>
    %89 = arith.mulf %88, %86 : vector<1x128xf32>
    %90 = arith.mulf %81, %53 : vector<1x128xf32>
    %91 = arith.addf %89, %90 : vector<1x128xf32>
    %c0_55 = arith.constant 0 : index
    %c0_56 = arith.constant 0 : index
    %92 = vector.load %arg16[%c0_55, %c0_56] : memref<1x128xf32, #tpu.memory_space<vmem>>, vector<1x128xf32>
    tpu.vector_store %arg16[%c0_55, %c0_56], %91 {strides = array<i32>} : memref<1x128xf32, #tpu.memory_space<vmem>>, vector<1x128xf32>,
    %c0_57 = arith.constant 0 : index
    %c0_58 = arith.constant 0 : index
    %93 = vector.load %arg13[%c0_57, %c0_58] : memref<128x6xf32, #tpu.memory_space<vmem>>, vector<128x6xf32>
    %cst_59 = arith.constant dense<0.000000e+00> : vector<1x6xf32>
    %94 = tpu.matmul %91, %93, %cst_59 {dimension_numbers = #tpu.dot_dimension_numbers<[1], [0], [0], [1], [0, 0, 1, 1], [], []>} : vector<1x128xf32>, vector<128x6xf32>, vector<1x6xf32> -> vector<1x6xf32>
    %c0_60 = arith.constant 0 : index
    %c0_61 = arith.constant 0 : index
    %95 = vector.load %arg14[%c0_60, %c0_61] : memref<1x6xf32, #tpu.memory_space<vmem>>, vector<1x6xf32>
    %96 = arith.addf %94, %95 : vector<1x6xf32>
    %c0_62 = arith.constant 0 : index
    %c0_63 = arith.constant 0 : index
    %97 = vector.load %arg15[%c0_62, %c0_63] : memref<1x6xf32, #tpu.memory_space<vmem>>, vector<1x6xf32>
    tpu.vector_store %arg15[%c0_62, %c0_63], %96 {strides = array<i32>} : memref<1x6xf32, #tpu.memory_space<vmem>>, vector<1x6xf32>,
    return
  }
}

</mosaic_0001>

<bundles_post_ra>
// kernel: recurrent_policy_forward.1
= control target key start
LH: loop header
LB: loop body
LE: loop exit
PB: predicated region body
PF: predicated region fallthrough
CT: control target
= control target key end

     0   :  { %s1164_s0 = inlined_call_operand.vmem [shape: f32[1,32], index: 0, kind: input, shape index: {}]   ;;  %s1165_s1 = inlined_call_operand.<no memory space> [shape: f32[1,1], index: 1, kind: input, shape index: {}]   ;;  %s1166_s2 = inlined_call_operand.vmem [shape: f32[1,128], index: 2, kind: input, shape index: {}]   ;;  %s1167_s3 = inlined_call_operand.vmem [shape: f32[1,16], index: 3, kind: input, shape index: {}]   ;;  %s1168_s4 = inlined_call_operand.vmem [shape: f32[3,16], index: 4, kind: input, shape index: {}]   ;;  %s1169_s5 = inlined_call_operand.hbm [shape: f32[3,16,16], index: 5, kind: input, shape index: {}]   ;;  %s1170_s6 = inlined_call_operand.vmem [shape: f32[3,16], index: 6, kind: input, shape index: {}]   ;;  %s1171_s7 = inlined_call_operand.vmem [shape: f32[3,16], index: 7, kind: input, shape index: {}]   ;;  %s1172_s8 = inlined_call_operand.vmem [shape: f32[32,384], index: 8, kind: input, shape index: {}]   ;;  %s1173_s9 = inlined_call_operand.hbm [shape: f32[16,384], index: 9, kind: input, shape index: {}]   ;;  %s1174_s10 = inlined_call_operand.hbm [shape: f32[128,384], index: 10, kind: input, shape index: {}]   ;;  %s1175_s11 = inlined_call_operand.vmem [shape: f32[1,384], index: 11, kind: input, shape index: {}]   ;;  %s1176_s12 = inlined_call_operand.vmem [shape: f32[1,384], index: 12, kind: input, shape index: {}]   ;;  %s1177_s13 = inlined_call_operand.vmem [shape: f32[128,6], index: 13, kind: input, shape index: {}]   ;;  %s1178_s14 = inlined_call_operand.vmem [shape: f32[1,6], index: 14, kind: input, shape index: {}]   ;;  %s1179_s15 = inlined_call_operand.hbm [shape: f32[1,6], index: 15, kind: output, shape index: {0}]   ;;  %s1180_s16 = inlined_call_operand.hbm [shape: f32[1,128], index: 16, kind: output, shape index: {1}]   ;;  %s1181_s17 = inlined_call_operand.hbm [shape: f32[1,16], index: 17, kind: output, shape index: {2}]  }
   0x1   :  { %1182 = sst [smem:[#allocation17_spill]] %s1164_s0 }
   0x2   :  { %1183 = sst [smem:[#allocation18_spill]] %s1165_s1 }
   0x3   :  { %s1184_s26 = sld [smem:[#allocation18_spill]] }
   0x9   :  { %v23_v0 = vstv %s1184_s26 }
   0xa   :  { %24 = vst [vmem:[#allocation2] sm:$0x1] %v23_v0 }
   0xb   :  { %25 = vsyncpa [#allocation4], 0 }
   0xc   :  { %26 = vsyncpa [#allocation7], 0 }
   0xd   :  { %27 = vsyncpa [#allocation5], 0  ;;  %s62_s29 = sshll.u32 %s1173_s9, 4  ;;  %s63_s29 = int_to_ptr.hbm [resolvable:$true] %s62_s29 }
   0xe   :  { %28 = vsyncpa [#allocation11], 0  ;;  %s855_s0 = smov [#allocation6]   ;;  %s43_s1 = sshll.u32 %s1169_s5, 4  ;;  %s44_s1 = int_to_ptr.hbm [resolvable:$true] %s43_s1 }
   0xf   :  { %s64_s30 = sshll.u32 %s855_s0, 4  ;;  %s856_s20 = smov 384   ;;  %s65_s30 = int_to_ptr.vmem [resolvable:$true] %s64_s30 }
  0x10   :  { %s857_s21 = smov 24   ;;  %s858_s22 = smov [#allocation3]  }
  0x11   :  { %70 = dma.hbm_to_vmem [thread:$0]  %s63_s29, 768, %s65_s30, [#allocation7], %s856_s20, %s856_s20, %s857_s21  }
  0x12   :  { %s45_s23 = sshll.u32 %s858_s22, 4  ;;  %s859_s24 = smov 128   ;;  %s46_s23 = int_to_ptr.vmem [resolvable:$true] %s45_s23 }
  0x13   :  { %s860_s25 = smov 8   ;;  %s75_s27 = sshll.u32 %s1174_s10, 4  ;;  %s76_s27 = int_to_ptr.hbm [resolvable:$true] %s75_s27 }
  0x14   :  { %51 = dma.hbm_to_vmem [thread:$0]  %s44_s1, 768, %s46_s23, [#allocation4], %s859_s24, %s859_s24, %s860_s25  }
  0x15   :  { %s861_s28 = smov [#allocation8]  }
  0x16   :  { %s77_s0 = sshll.u32 %s861_s28, 4  ;;  %s78_s0 = int_to_ptr.vmem [resolvable:$true] %s77_s0 }
  0x17   :  { %83 = dma.hbm_to_vmem [thread:$0]  %s76_s27, 6144, %s78_s0, [#allocation7], %s856_s20, %s856_s20, %s857_s21  }
  0x18   :  { %847 = dma.done.wait [#allocation4], 768  }
  0x19   :  { %848 = vsyncadd [#allocation4], 4294966528 }
  0x1a   :  { %849 = dma.done.wait [#allocation7], 6912  }
  0x1b   :  { %850 = vsyncadd [#allocation7], 4294960384  ;;  %v862_v1 = vmov 0   ;;  %v117_v2 = vld [vmem:[#allocation3 + $0x8] sm:$0xff]  ;;  %v149_v3 = vld [vmem:[#allocation3 + $0x18] sm:$0xff]  ;;  %vm119_vm0 = vcmask 130048  }
  0x1c   :  { %682 = vset.pattern.permute.xlu0 %v862_v1  ;;  %v116_v4 = vld [vmem:[#allocation3] sm:$0xff]  ;;  %137 = vmatpush.msra.mxu0 %v117_v2  ;;  %v148_v5 = vld [vmem:[#allocation3 + $0x10] sm:$0xff]  ;;  %v971_v6 = vld [vmem:[%s1167_s3] sm:$0x1]  ;;  %s1185_s23 = sld [smem:[#allocation17_spill]]  ;;  %vm331_vm1 = vcmask 261120  }
  0x1d   :  { %165 = vmatpush.msra.mxu1 %v149_v3  ;;  %v104_v7 = vld [vmem:[#allocation2] sm:$0x1]  ;;  %v177_v8 = vld [vmem:[#allocation3 + $0x28] sm:$0xff]  ;;  %v176_v9 = vld [vmem:[#allocation3 + $0x20] sm:$0xff]  ;;  %vm246_vm10 = vcmask 122880   ;;  %s627_s5 = sshll.u32 %s1180_s16, 4  ;;  %s628_s5 = int_to_ptr.hbm [resolvable:$true] %s627_s5 }
  0x1e   :  { %109 = vperm.xlu0 %682, %v104_v7   ;;  %138 = vmatpush.msra.mxu0 %v116_v4  ;;  %v259_v11 = vld [vmem:[%s1172_s8 + $0x48] sm:$0xff]  ;;  %v267_v12 = vld [vmem:[#allocation6 + $0x28] sm:$0xff]  ;;  %v256_v13 = vld [vmem:[%s1172_s8 + $0x30] sm:$0xff]  ;;  %s864_s29 = smov [#allocation12]   ;;  %s865_s18 = smov [#allocation9]  }
  0x1f   :  { %166 = vmatpush.msra.mxu1 %v148_v5  ;;  %658 = vmatmul.msk.f32.vlgmr.msra.gmra.mxu0 %vm119_vm0, %v971_v6  ;;  %v106_v14 = vld [vmem:[%s1168_s4] sm:$0x1]  ;;  %v143_v16 = vld [vmem:[%s1168_s4 + $0x1] sm:$0x1]  ;;  %v253_v18 = vld [vmem:[%s1172_s8 + $0x18] sm:$0xff]  ;;  %s636_s3 = sshll.u32 %s864_s29, 4  ;;  %s637_s3 = int_to_ptr.vmem [resolvable:$true] %s636_s3 }
  0x20   :  { %659 = vmatmul.msk.f32.vlgmr.msra.gmra.mxu1 %vm119_vm0, %v971_v6  ;;  %193 = vmatpush.msra.mxu2 %v177_v8  ;;  %v264_v17 = vld [vmem:[#allocation6 + $0x10] sm:$0xff]  ;;  %v451_v19 = vld [vmem:[#allocation8 + $0x168] sm:$0xff]  ;;  %v448_v21 = vld [vmem:[#allocation8 + $0x150] sm:$0xff]  ;;  %s614_s16 = sshll.u32 %s865_s18, 4  ;;  %s615_s16 = int_to_ptr.vmem [resolvable:$true] %s614_s16 }
  0x21   :  { %325 = vmatpush.msrb.mxu1 %v267_v12  ;;  %v250_v20 = vld [vmem:[%s1172_s8] sm:$0xff]  ;;  %v452_v22 = vld [vmem:[#allocation8 + $0x170] sm:$0xff]  ;;  %v439_v39 = vld [vmem:[#allocation8 + $0x108] sm:$0xff] }
  0x22   :  { %194 = vmatpush.msra.mxu2 %v176_v9  ;;  %v445_v25 = vld [vmem:[#allocation8 + $0x138] sm:$0xff]  ;;  %v145_v28 = vld [vmem:[%s1170_s6 + $0x1] sm:$0x1]  ;;  %v443_v40 = vld [vmem:[#allocation8 + $0x128] sm:$0xff] }
  0x23   :  { %660 = vmatmul.msk.f32.vlgmr.msra.gmra.mxu2 %vm119_vm0, %v971_v6  ;;  %326 = vmatpush.msrb.mxu1 %v264_v17  ;;  %v449_v26 = vld [vmem:[#allocation8 + $0x158] sm:$0xff]  ;;  %v150_v30 = vld [vmem:[%s1171_s7 + $0x1] sm:$0x1]  ;;  %v436_v43 = vld [vmem:[#allocation8 + $0xf0] sm:$0xff] }
  0x24   :  { %347 = vmatpush.msrb.mxu2 %v259_v11  ;;  %v114_v27 = vld [vmem:[%s1170_s6] sm:$0x1]  ;;  %v442_v33 = vld [vmem:[#allocation8 + $0x120] sm:$0xff]  ;;  %v440_v44 = vld [vmem:[#allocation8 + $0x110] sm:$0xff] }
  0x25   :  { %462 = vmatpush.msra.mxu1 %v451_v19  ;;  %v118_v29 = vld [vmem:[%s1171_s7] sm:$0x1]  ;;  %v446_v34 = vld [vmem:[#allocation8 + $0x140] sm:$0xff]  ;;  %v265_v49 = vld [vmem:[#allocation6 + $0x18] sm:$0xff] }
  0x26   :  { %348 = vmatpush.msrb.mxu2 %v256_v13  ;;  %v433_v47 = vld [vmem:[#allocation8 + $0xd8] sm:$0xff]  ;;  %v430_v50 = vld [vmem:[#allocation8 + $0xc0] sm:$0xff]  ;;  %285 = vmatpush.msra.mxu3 %v265_v49  ;;  %v262_v52 = vld [vmem:[#allocation6] sm:$0xff] }
  0x27   :  { %463 = vmatpush.msra.mxu1 %v448_v21  ;;  %v437_v48 = vld [vmem:[#allocation8 + $0xf8] sm:$0xff]  ;;  %v434_v51 = vld [vmem:[#allocation8 + $0xe0] sm:$0xff]  ;;  %v427_v53 = vld [vmem:[#allocation8 + $0xa8] sm:$0xff] }
  0x28   :  { %349 = vmatpush.msrb.mxu2 %v253_v18  ;;  %v431_v54 = vld [vmem:[#allocation8 + $0xc8] sm:$0xff]  ;;  %286 = vmatpush.msra.mxu3 %v262_v52  ;;  %v424_v56 = vld [vmem:[#allocation8 + $0x90] sm:$0xff]  ;;  %v263_v60 = vld [vmem:[#allocation6 + $0x8] sm:$0xff] }
  0x29   :  { %464 = vmatpush.msra.mxu1 %v445_v25  ;;  %v260_v55 = vld [vmem:[%s1172_s8 + $0x50] sm:$0xff]  ;;  %v257_v59 = vld [vmem:[%s1172_s8 + $0x38] sm:$0xff]  ;;  %v254_v63 = vld [vmem:[%s1172_s8 + $0x20] sm:$0xff] }
  0x2a   :  { %350 = vmatpush.msrb.mxu2 %v250_v20  ;;  %v428_v57 = vld [vmem:[#allocation8 + $0xb0] sm:$0xff]  ;;  %367 = vmatpush.msrb.mxu3 %v260_v55  ;;  %v421_v61 = vld [vmem:[#allocation8 + $0x78] sm:$0xff]  ;;  %v418_v1 = vld [vmem:[#allocation8 + $0x60] sm:$0xff] }
  0x2b   :  { %465 = vmatpush.msra.mxu1 %v442_v33  ;;  %v266_v58 = vld [vmem:[#allocation6 + $0x20] sm:$0xff]  ;;  %v425_v62 = vld [vmem:[#allocation8 + $0x98] sm:$0xff]  ;;  %v422_v2 = vld [vmem:[#allocation8 + $0x80] sm:$0xff] }
  0x2c   :  { %482 = vmatpush.msra.mxu2 %v452_v22  ;;  %305 = vmatpush.msrb.mxu0 %v266_v58  ;;  %v1030_v7 = vld [vmem:[%s1185_s23] sm:$0x1]  ;;  %v251_v8 = vld [vmem:[%s1172_s8 + $0x8] sm:$0xff]  ;;  %v261_v9 = vld [vmem:[%s1172_s8 + $0x58] sm:$0xff] }
  0x2d   :  { %466 = vmatpush.msra.mxu1 %v439_v39  ;;  %368 = vmatpush.msrb.mxu3 %v257_v59  ;;  %v419_v11 = vld [vmem:[#allocation8 + $0x68] sm:$0xff]  ;;  %v258_v12 = vld [vmem:[%s1172_s8 + $0x40] sm:$0xff]  ;;  %v412_v13 = vld [vmem:[#allocation8 + $0x30] sm:$0xff] }
  0x2e   :  { %483 = vmatpush.msra.mxu2 %v449_v26  ;;  %306 = vmatpush.msrb.mxu0 %v263_v60  ;;  %v409_v17 = vld [vmem:[#allocation8 + $0x18] sm:$0xff]  ;;  %v252_v19 = vld [vmem:[%s1172_s8 + $0x10] sm:$0xff]  ;;  %v406_v21 = vld [vmem:[#allocation8] sm:$0xff] }
  0x2f   :  { %467 = vmatpush.msra.mxu1 %v436_v43  ;;  %369 = vmatpush.msrb.mxu3 %v254_v63  ;;  %v413_v18 = vld [vmem:[#allocation8 + $0x38] sm:$0xff]  ;;  %v450_v58 = vld [vmem:[#allocation8 + $0x160] sm:$0xff]  ;;  %v447_v59 = vld [vmem:[#allocation8 + $0x148] sm:$0xff] }
  0x30   :  { %484 = vmatpush.msra.mxu2 %v446_v34  ;;  %387 = vmatpush.msra.mxu0 %v261_v9  ;;  %v444_v60 = vld [vmem:[#allocation8 + $0x130] sm:$0xff] }
  0x31   :  { %468 = vmatpush.msra.mxu1 %v433_v47  ;;  %370 = vmatpush.msrb.mxu3 %v251_v8  ;;  %v432_v63 = vld [vmem:[#allocation8 + $0xd0] sm:$0xff] }
  0x32   :  { %485 = vmatpush.msra.mxu2 %v443_v40  ;;  %388 = vmatpush.msra.mxu0 %v258_v12  ;;  %v173_v40 = vld [vmem:[%s1170_s6 + $0x2] sm:$0x1]  ;;  %v408_v8 = vld [vmem:[#allocation8 + $0x10] sm:$0xff] }
  0x33   :  { %469 = vmatpush.msra.mxu1 %v430_v50  ;;  %666 = vmatmul.msk.f32.vlgmr.msrb.gmra.mxu2 %vm331_vm1, %v1030_v7  ;;  %v585_v9 = vld [vmem:[%s1177_s13 + $0x78] sm:$0xff]  ;;  %v582_v12 = vld [vmem:[%s1177_s13 + $0x60] sm:$0xff] }
  0x34   :  { %486 = vmatpush.msra.mxu2 %v440_v44 }
  0x35   :  { %470 = vmatpush.msra.mxu1 %v427_v53 }
  0x36   :  { %487 = vmatpush.msra.mxu2 %v437_v48 }
  0x37   :  { %471 = vmatpush.msra.mxu1 %v424_v56 }
  0x38   :  { %488 = vmatpush.msra.mxu2 %v434_v51 }
  0x39   :  { %472 = vmatpush.msra.mxu1 %v421_v61  ;;  %v441_v61 = vld [vmem:[#allocation8 + $0x118] sm:$0xff] }
  0x3a   :  { %489 = vmatpush.msra.mxu2 %v431_v54 }
  0x3b   :  { %473 = vmatpush.msra.mxu1 %v418_v1  ;;  %v426_v1 = vld [vmem:[#allocation8 + $0xa0] sm:$0xff] }
  0x3c   :  { %490 = vmatpush.msra.mxu2 %v428_v57  ;;  %v453_v57 = vld [vmem:[#allocation8 + $0x178] sm:$0xff] }
  0x3e   :  { %491 = vmatpush.msra.mxu2 %v425_v62  ;;  %v435_v62 = vld [vmem:[#allocation8 + $0xe8] sm:$0xff] }
  0x40   :  { %492 = vmatpush.msra.mxu2 %v422_v2  ;;  %v423_v2 = vld [vmem:[#allocation8 + $0x88] sm:$0xff] }
  0x42   :  { %493 = vmatpush.msra.mxu2 %v419_v11  ;;  %v583_v11 = vld [vmem:[%s1177_s13 + $0x68] sm:$0xff] }
  0x90   :  { %v110_v10 = vpop.permute.xlu0 %109 }
  0x91   :  { %v988_v15 = vperm.slane %v110_v10, 0  ;;  %v415_v10 = vld [vmem:[#allocation8 + $0x48] sm:$0xff] }
  0x92   :  { %474 = vmatpush.msra.mxu1 %v415_v10  ;;  %v584_v10 = vld [vmem:[%s1177_s13 + $0x70] sm:$0xff] }
  0x93   :  { %v113_v23 = vmul.f32 %v988_v15, %v106_v14  ;;  %v144_v24 = vmul.f32 %v143_v16, %v988_v15  ;;  %v416_v14 = vld [vmem:[#allocation8 + $0x50] sm:$0xff]  ;;  %v255_v16 = vld [vmem:[%s1172_s8 + $0x28] sm:$0xff] }
  0x94   :  { %475 = vmatpush.msra.mxu1 %v412_v13  ;;  %494 = vmatpush.msra.mxu2 %v416_v14  ;;  %v581_v14 = vld [vmem:[%s1177_s13 + $0x58] sm:$0xff] }
  0x95   :  { %v115_v31 = vadd.f32 %v114_v27, %v113_v23  ;;  %v146_v32 = vadd.f32 %v145_v28, %v144_v24  ;;  %389 = vmatpush.msra.mxu0 %v255_v16  ;;  %v410_v24 = vld [vmem:[#allocation8 + $0x20] sm:$0xff]  ;;  %v407_v27 = vld [vmem:[#allocation8 + $0x8] sm:$0xff] }
  0x96   :  { %476 = vmatpush.msra.mxu1 %v409_v17  ;;  %495 = vmatpush.msra.mxu2 %v413_v18  ;;  %v171_v28 = vld [vmem:[%s1168_s4 + $0x2] sm:$0x1]  ;;  %v580_v18 = vld [vmem:[%s1177_s13 + $0x50] sm:$0xff]  ;;  %s616_s4 = sshll.u32 %s1179_s15, 4  ;;  %s617_s4 = int_to_ptr.hbm [resolvable:$true] %s616_s4 }
  0x97   :  { %390 = vmatpush.msra.mxu0 %v252_v19  ;;  %v1104_v16 = vld [vmem:[%s1175_s11] sm:$0x7]  ;;  %s638_s11 = sshll.u32 %s1181_s17, 4  ;;  %s639_s11 = int_to_ptr.hbm [resolvable:$true] %s638_s11 }
  0x98   :  { %477 = vmatpush.msra.mxu1 %v406_v21  ;;  %496 = vmatpush.msra.mxu2 %v410_v24  ;;  %v1109_v17 = vld [vmem:[%s1176_s12] sm:$0x7]  ;;  %v579_v21 = vld [vmem:[%s1177_s13 + $0x48] sm:$0xff] }
  0x9a   :  { %497 = vmatpush.msra.mxu2 %v407_v27 }
  0x9c   :  { %v140_v35 = vpop.f32.mrf.mxu0 }
  0x9d   :  { %v168_v36 = vpop.f32.mrf.mxu1  ;;  %v141_v37 = vadd.f32 %v140_v35, %v118_v29 }
  0x9e   :  { %v169_v38 = vadd.f32 %v168_v36, %v150_v30  ;;  %v178_v30 = vld [vmem:[%s1171_s7 + $0x2] sm:$0x1]  ;;  %v1063_v36 = vld [vmem:[%s1166_s2] sm:$0x1] }
  0x9f   :  { %v199_v41 = vadd.f32 %v141_v37, %v115_v31  ;;  %v172_v37 = vmul.f32 %v171_v28, %v988_v15  ;;  %498 = vmatmul.f32.vlgmr.msra.gmra.mxu2 %v1063_v36  ;;  %v577_v28 = vld [vmem:[%s1177_s13 + $0x38] sm:$0xff] }
  0xa0   :  { %v219_v42 = vadd.f32 %v169_v38, %v146_v32 }
  0xa1   :  { %v661_v45 = vmul.f32 -1.442695, %v199_v41 }
  0xa2   :  { %v662_v46 = vmul.f32 -1.442695, %v219_v42 }
  0xa3   :  { %683 = vpow2.f32 %v661_v45  ;;  %v174_v45 = vadd.f32 %v173_v40, %v172_v37  ;;  %v574_v40 = vld [vmem:[%s1177_s13 + $0x20] sm:$0xff] }
  0xa4   :  { %685 = vpow2.f32 %v662_v46 }
  0xa6   :  { %v196_v31 = vpop.f32.mrf.mxu2 }
  0xa7   :  { %v197_v38 = vadd.f32 %v196_v31, %v178_v30  ;;  %v457_v30 = vperm.slane %v1109_v17, 1  ;;  %v576_v31 = vld [vmem:[%s1177_s13 + $0x30] sm:$0xff] }
  0xa9   :  { %v684_v0 = vpop.eup %683 }
  0xaa   :  { %v686_v3 = vpop.eup %685  ;;  %v1022_v4 = vadd.f32 1.0, %v684_v0  ;;  %v429_v0 = vld [vmem:[#allocation8 + $0xb8] sm:$0xff] }
  0xab   :  { %v1024_v5 = vadd.f32 1.0, %v686_v3  ;;  %v420_v3 = vld [vmem:[#allocation8 + $0x70] sm:$0xff] }
  0xac   :  { %687 = vrcp.f32 %v1022_v4  ;;  %v215_v32 = vand.u32 2147483648, %v1022_v4  ;;  %v213_v34 = vand.u32 2147483647, %v1022_v4  ;;  %vm209_vm3 = vweird.f32 %v1022_v4 }
  0xad   :  { %689 = vrcp.f32 %v1024_v5  ;;  %v235_v15 = vand.u32 2147483648, %v1024_v5  ;;  %vm229_vm7 = vweird.f32 %v1024_v5  ;;  %v233_v47 = vand.u32 2147483647, %v1024_v5 }
  0xae   :  { %v216_v41 = vor.u32 1.1754944e-38, %v215_v32  ;;  %vm214_vm5 = vcmp.eq.f32.partialorder %v213_v34, 8.507059e+37  ;;  %v398_v34 = vperm.slane %v1104_v16, 1 }
  0xaf   :  { %v236_v50 = vor.u32 1.1754944e-38, %v235_v15  ;;  %vm234_vm9 = vcmp.eq.f32.partialorder %v233_v47, 8.507059e+37  ;;  %v571_v15 = vld [vmem:[%s1177_s13 + $0x8] sm:$0xff] }
  0xb2   :  { %v688_v20 = vpop.eup %687 }
  0xb3   :  { %v690_v22 = vpop.eup %689  ;;  %v205_v23 = vmul.f32 %v688_v20, %v1022_v4  ;;  %vm210_vm2 = vweird.f32 %v688_v20  ;;  %v417_v4 = vld [vmem:[#allocation8 + $0x58] sm:$0xff] }
  0xb4   :  { %v225_v25 = vmul.f32 %v690_v22, %v1024_v5  ;;  %vm211_vm4 = vmor %vm209_vm3, %vm210_vm2  ;;  %vm230_vm6 = vweird.f32 %v690_v22  ;;  %v414_v5 = vld [vmem:[#allocation8 + $0x40] sm:$0xff]  ;;  %vm607_vm3 = vcmask 40960  }
  0xb5   :  { %v206_v26 = vsub.f32 1.0, %v205_v23  ;;  %vm231_vm8 = vmor %vm229_vm7, %vm230_vm6  ;;  %v456_v23 = vperm.slane %v1109_v17, 0 }
  0xb6   :  { %v226_v29 = vsub.f32 1.0, %v225_v25  ;;  %v352_v19 = vpop.f32.mrf.mxu2  ;;  %v578_v25 = vld [vmem:[%s1177_s13 + $0x40] sm:$0xff] }
  0xb7   :  { %v207_v33 = vmul.f32 %v688_v20, %v206_v26 }
  0xb8   :  { %v227_v35 = vmul.f32 %v690_v22, %v226_v29 }
  0xb9   :  { %v208_v39 = vadd.f32 %v688_v20, %v207_v33 }
  0xba   :  { %v228_v44 = vadd.f32 %v690_v22, %v227_v35  ;;  %v575_v35 = vld [vmem:[%s1177_s13 + $0x28] sm:$0xff] }
  0xbb   :  { %v212_v42 = vsel %vm211_vm4, %v688_v20, %v208_v39  ;;  %v397_v20 = vperm.slane %v1104_v16, 0 }
  0xbc   :  { %v217_v43 = vsel %vm214_vm5, %v216_v41, %v212_v42  ;;  %v232_v49 = vsel %vm231_vm8, %v690_v22, %v228_v44 }
  0xbd   :  { %v239_v46 = vmul.f32 %v217_v43, %v197_v38  ;;  %v237_v51 = vsel %vm234_vm9, %v236_v50, %v232_v49  ;;  %v573_v43 = vld [vmem:[%s1177_s13 + $0x18] sm:$0xff] }
  0xbe   :  { %v242_v52 = vsub.f32 1.0, %v237_v51  ;;  %v244_v55 = vmul.f32 %v237_v51, %v971_v6  ;;  %v438_v6 = vld [vmem:[#allocation8 + $0x100] sm:$0xff] }
  0xbf   :  { %v240_v48 = vadd.f32 %v239_v46, %v174_v45  ;;  %v572_v45 = vld [vmem:[%s1177_s13 + $0x10] sm:$0xff] }
  0xc1   :  { %691 = vtanh.f32 %v240_v48  ;;  %v570_v48 = vld [vmem:[%s1177_s13] sm:$0xff]  ;;  %s863_s13 = smov [#allocation10]  }
  0xc2   :  { %s625_s27 = sshll.u32 %s863_s13, 4  ;;  %s626_s27 = int_to_ptr.vmem [resolvable:$true] %s625_s27 }
  0xc7   :  { %v692_v53 = vpop.eup %691 }
  0xc8   :  { %v243_v54 = vmul.f32 %v692_v53, %v242_v52 }
  0xca   :  { %v245_v56 = vadd.f32 %v244_v55, %v243_v54 }
  0xcc   :  { %663 = vmatmul.msk.f32.vlgmr.msra.gmra.mxu3 %vm119_vm0, %v245_v56  ;;  %664 = vmatmul.msk.f32.vlgmr.msrb.gmra.mxu0 %vm119_vm0, %v245_v56  ;;  %247 = vst.msk [vmem:[#allocation12] sm:$0x1] %vm246_vm10, %v245_v56 }
  0xcd   :  { %665 = vmatmul.msk.f32.vlgmr.msrb.gmra.mxu1 %vm119_vm0, %v245_v56  ;;  %502 = vmatpush.msra.mxu3 %v453_v57  ;;  %v458_v57 = vperm.slane %v1109_v17, 2 }
  0xce   :  { %587 = vmatpush.msrb.mxu0 %v585_v9 }
  0xcf   :  { %503 = vmatpush.msra.mxu3 %v450_v58 }
  0xd0   :  { %588 = vmatpush.msrb.mxu0 %v584_v10 }
  0xd1   :  { %504 = vmatpush.msra.mxu3 %v447_v59 }
  0xd2   :  { %589 = vmatpush.msrb.mxu0 %v583_v11 }
  0xd3   :  { %505 = vmatpush.msra.mxu3 %v444_v60 }
  0xd4   :  { %667 = vmatmul.msk.f32.vlgmr.msrb.gmra.mxu3 %vm331_vm1, %v1030_v7  ;;  %668 = vmatmul.msk.f32.vlgmr.msra.gmra.mxu0 %vm331_vm1, %v1030_v7  ;;  %v411_v7 = vld [vmem:[#allocation8 + $0x28] sm:$0xff] }
  0xd5   :  { %478 = vmatmul.f32.vlgmr.msra.gmra.mxu1 %v1063_v36  ;;  %506 = vmatpush.msra.mxu3 %v441_v61 }
  0xd6   :  { %590 = vmatpush.msrb.mxu0 %v582_v12 }
  0xd7   :  { %507 = vmatpush.msra.mxu3 %v438_v6 }
  0xd8   :  { %591 = vmatpush.msrb.mxu0 %v581_v14 }
  0xd9   :  { %508 = vmatpush.msra.mxu3 %v435_v62  ;;  %v399_v62 = vperm.slane %v1104_v16, 2 }
  0xda   :  { %592 = vmatpush.msrb.mxu0 %v580_v18 }
  0xdb   :  { %509 = vmatpush.msra.mxu3 %v432_v63 }
  0xdc   :  { %593 = vmatpush.msrb.mxu0 %v579_v21 }
  0xdd   :  { %510 = vmatpush.msra.mxu3 %v429_v0 }
  0xde   :  { %594 = vmatpush.msrb.mxu0 %v578_v25 }
  0xdf   :  { %511 = vmatpush.msra.mxu3 %v426_v1 }
  0xe0   :  { %595 = vmatpush.msrb.mxu0 %v577_v28 }
  0xe1   :  { %512 = vmatpush.msra.mxu3 %v423_v2 }
  0xe2   :  { %596 = vmatpush.msrb.mxu0 %v576_v31 }
  0xe3   :  { %513 = vmatpush.msra.mxu3 %v420_v3 }
  0xe4   :  { %597 = vmatpush.msrb.mxu0 %v575_v35 }
  0xe5   :  { %514 = vmatpush.msra.mxu3 %v417_v4 }
  0xe6   :  { %598 = vmatpush.msrb.mxu0 %v574_v40 }
  0xe7   :  { %515 = vmatpush.msra.mxu3 %v414_v5 }
  0xe8   :  { %599 = vmatpush.msrb.mxu0 %v573_v43 }
  0xe9   :  { %516 = vmatpush.msra.mxu3 %v411_v7 }
  0xea   :  { %600 = vmatpush.msrb.mxu0 %v572_v45 }
  0xeb   :  { %517 = vmatpush.msra.mxu3 %v408_v8 }
  0xec   :  { %518 = vmatmul.f32.vlgmr.msra.gmra.mxu3 %v1063_v36  ;;  %601 = vmatpush.msrb.mxu0 %v571_v15 }
  0xee   :  { %602 = vmatpush.msrb.mxu0 %v570_v48 }
 0x122   :  { %v499_v33 = vpop.f32.mrf.mxu2 }
 0x123   :  { %v500_v42 = vadd.f32 %v499_v33, %v457_v30 }
 0x149   :  { %v308_v37 = vpop.f32.mrf.mxu0 }
 0x14a   :  { %v1096_v13 = vpop.f32.mrf.mxu1 }
 0x14f   :  { %v288_v22 = vpop.f32.mrf.mxu3 }
 0x150   :  { %v353_v24 = vadd.f32 %v352_v19, %v288_v22 }
 0x151   :  { %v392_v56 = vpop.f32.mrf.mxu0 }
 0x152   :  { %v403_v26 = vadd.f32 %v397_v20, %v353_v24  ;;  %v479_v27 = vpop.f32.mrf.mxu1  ;;  %v393_v6 = vadd.f32 %v392_v56, %v1096_v13 }
 0x153   :  { %v480_v29 = vadd.f32 %v479_v27, %v456_v23 }
 0x154   :  { %v405_v8 = vadd.f32 %v399_v62, %v393_v6 }
 0x155   :  { %v522_v32 = vadd.f32 %v480_v29, %v403_v26 }
 0x157   :  { %v669_v38 = vmul.f32 -1.442695, %v522_v32  ;;  %v372_v39 = vpop.f32.mrf.mxu3 }
 0x158   :  { %v373_v41 = vadd.f32 %v372_v39, %v308_v37 }
 0x159   :  { %693 = vpow2.f32 %v669_v38 }
 0x15a   :  { %v404_v44 = vadd.f32 %v398_v34, %v373_v41 }
 0x15c   :  { %v542_v46 = vadd.f32 %v500_v42, %v404_v44 }
 0x15e   :  { %v670_v47 = vmul.f32 -1.442695, %v542_v46 }
 0x15f   :  { %v694_v49 = vpop.eup %693 }
 0x160   :  { %v526_v50 = vadd.f32 1.0, %v694_v49  ;;  %695 = vpow2.f32 %v670_v47 }
 0x162   :  { %697 = vrcp.f32 %v526_v50  ;;  %v538_v58 = vand.u32 2147483648, %v526_v50  ;;  %v536_v60 = vand.u32 2147483647, %v526_v50  ;;  %vm532_vm12 = vweird.f32 %v526_v50 }
 0x164   :  { %v539_v3 = vor.u32 1.1754944e-38, %v538_v58  ;;  %vm537_vm14 = vcmp.eq.f32.partialorder %v536_v60, 8.507059e+37 }
 0x166   :  { %v696_v51 = vpop.eup %695 }
 0x167   :  { %v546_v52 = vadd.f32 1.0, %v696_v51 }
 0x168   :  { %v698_v53 = vpop.eup %697 }
 0x169   :  { %699 = vrcp.f32 %v546_v52  ;;  %v528_v54 = vmul.f32 %v698_v53, %v526_v50  ;;  %vm533_vm11 = vweird.f32 %v698_v53  ;;  %v558_v10 = vand.u32 2147483648, %v546_v52 }
 0x16a   :  { %vm534_vm13 = vmor %vm532_vm12, %vm533_vm11  ;;  %v556_v12 = vand.u32 2147483647, %v546_v52  ;;  %vm552_vm0 = vweird.f32 %v546_v52 }
 0x16b   :  { %v529_v55 = vsub.f32 1.0, %v528_v54  ;;  %v559_v16 = vor.u32 1.1754944e-38, %v558_v10 }
 0x16c   :  { %vm557_vm2 = vcmp.eq.f32.partialorder %v556_v12, 8.507059e+37 }
 0x16d   :  { %v530_v59 = vmul.f32 %v698_v53, %v529_v55 }
 0x16f   :  { %v700_v61 = vpop.eup %699  ;;  %v519_v63 = vpop.f32.mrf.mxu3  ;;  %v531_v0 = vadd.f32 %v698_v53, %v530_v59 }
 0x170   :  { %v548_v1 = vmul.f32 %v700_v61, %v546_v52  ;;  %v520_v2 = vadd.f32 %v519_v63, %v458_v57  ;;  %vm553_vm15 = vweird.f32 %v700_v61 }
 0x171   :  { %v535_v4 = vsel %vm534_vm13, %v698_v53, %v531_v0  ;;  %vm554_vm1 = vmor %vm552_vm0, %vm553_vm15 }
 0x172   :  { %v549_v5 = vsub.f32 1.0, %v548_v1  ;;  %v540_v7 = vsel %vm537_vm14, %v539_v3, %v535_v4 }
 0x173   :  { %v562_v9 = vmul.f32 %v540_v7, %v520_v2 }
 0x174   :  { %v550_v11 = vmul.f32 %v700_v61, %v549_v5 }
 0x175   :  { %v563_v13 = vadd.f32 %v562_v9, %v405_v8 }
 0x176   :  { %v551_v14 = vadd.f32 %v700_v61, %v550_v11 }
 0x177   :  { %701 = vtanh.f32 %v563_v13 }
 0x178   :  { %v555_v17 = vsel %vm554_vm1, %v700_v61, %v551_v14 }
 0x179   :  { %v560_v18 = vsel %vm557_vm2, %v559_v16, %v555_v17 }
 0x17a   :  { %v565_v19 = vsub.f32 1.0, %v560_v18  ;;  %v567_v22 = vmul.f32 %v560_v18, %v1063_v36  ;;  %v586_v36 = vld [vmem:[%s1178_s14] sm:$0x1] }
 0x17d   :  { %v702_v20 = vpop.eup %701 }
 0x17e   :  { %v566_v21 = vmul.f32 %v702_v20, %v565_v19 }
 0x180   :  { %v568_v23 = vadd.f32 %v567_v22, %v566_v21 }
 0x182   :  { %603 = vmatmul.f32.vlgmr.msrb.gmra.mxu0 %v568_v23  ;;  %569 = vst [vmem:[#allocation10] sm:$0x1] %v568_v23 }
 0x183   :  { %630 = dma.vmem_to_hbm [thread:$0]  %s626_s27, 16, %s628_s5, [#allocation11]  }
 0x184   :  { %641 = dma.vmem_to_hbm [thread:$0]  %s637_s3, 16, %s639_s11, [#allocation11]  }
 0x1ff   :  { %v604_v24 = vpop.f32.mrf.mxu0 }
 0x200   :  { %v605_v25 = vadd.f32 %v604_v24, %v586_v36 }
 0x202   :  { %608 = vst.msk [vmem:[#allocation9] sm:$0x1] %vm607_vm3, %v605_v25 }
 0x203   :  { %619 = dma.vmem_to_hbm [thread:$0]  %s615_s16, 16, %s617_s4, [#allocation5]  }
 0x204   :  { %851 = dma.done.wait [#allocation5], 16  }
 0x205   :  { %852 = vsyncadd [#allocation5], 4294967280 }
 0x206   :  { %853 = dma.done.wait [#allocation11], 32  }
 0x207   :  { %854 = vsyncadd [#allocation11], 4294967264 }
 0x208   :  { %654 = vsyncpa [#allocation4], 1 }
 0x209   :  { %655 = vsyncpa [#allocation7], 1 }
 0x20a   :  { %656 = vsyncpa [#allocation5], 1 }
 0x20b   :  { %657 = vsyncpa [#allocation11], 1 }

</bundles_post_ra>
